<compile_context>
chip_gen: v5e
topology: v5e:2x2
jax: 0.10.0
libtpu: 0.0.40
codegen_flags: <defaults>
</compile_context>

<pallas_src>
import jax
import jax.numpy as jnp
from jax.experimental import pallas as pl
from jax.experimental.pallas import tpu as pltpu


# ----------------------------------------------------------------------------
# Kernel: pure matmul + bias on lane-dense blocks.
#   x_ref: (TR, P*K)    VMEM
#   w_ref: (P*K, P*dd)  VMEM (resident, block-diagonal, symmetrization pre-folded)
#   b_ref: (1, P*dd)    VMEM (resident, tiled, symmetrization pre-folded)
#   o_ref: (TR, P*dd)   VMEM
# ----------------------------------------------------------------------------
def _sqvec2symmat_kernel(x_ref, w_ref, b_ref, o_ref):
    y = jnp.dot(x_ref[...], w_ref[...], preferred_element_type=jnp.float32)
    o_ref[...] = (y + b_ref[...].astype(jnp.float32)).astype(o_ref.dtype)


# ----------------------------------------------------------------------------
# One-time parameter preprocessing (NOT on the forward hot path).
# weight: (d*d, input_dims) [nn.Linear layout], bias: (d*d,)
# Returns (w_blk, b_blk, pack) where pack = P (batch rows per lane-packed output row).
# ----------------------------------------------------------------------------
def fold_params(weight, bias, input_dims, output_dims, param_dtype=None):
    d = output_dims
    dd = d * d
    K = input_dims
    assert weight.shape == (dd, K)
    assert bias.shape == (dd,)

    # Fold 0.5*(A + A^T) symmetrization into the parameters (mathematically exact).
    w_t = weight.T.reshape(K, d, d)                              # (K, d, d)
    w_sym = (0.5 * (w_t + jnp.swapaxes(w_t, -1, -2))).reshape(K, dd)
    b_t = bias.reshape(d, d)
    b_sym = (0.5 * (b_t + b_t.T)).reshape(dd)

    # Lane packing factor: P batch rows per 128-lane output row (only when dd | 128).
    if dd < 128 and 128 % dd == 0:
        P = 128 // dd
    else:
        P = 1

    if P > 1:
        eye = jnp.eye(P, dtype=w_sym.dtype)
        # Block-diagonal: row p*K+k, col q*dd+j = w_sym[k, j] if p == q else 0.
        w_blk = jnp.einsum("pq,kd->pkqd", eye, w_sym).reshape(P * K, P * dd)
        b_blk = jnp.tile(b_sym, (P,)).reshape(1, P * dd)
    else:
        w_blk = w_sym
        b_blk = b_sym.reshape(1, dd)

    if param_dtype is not None:
        w_blk = w_blk.astype(param_dtype)
        b_blk = b_blk.astype(param_dtype)
    return w_blk, b_blk, P


# ----------------------------------------------------------------------------
# Forward: node_feats (B, K) -> (B, d, d) symmetric matrices.
# ----------------------------------------------------------------------------
def squared_vec2symmat(node_feats, w_blk, b_blk, output_dims, pack,
                       *, max_tile_rows=2048, vmem_limit_bytes=32 * 1024 * 1024):
    B, K = node_feats.shape
    d = output_dims
    dd = d * d
    P = pack
    PK = P * K
    Pdd = P * dd
    assert w_blk.shape == (PK, Pdd)
    assert b_blk.shape == (1, Pdd)

    # Pack P batch rows per output row.  Pad only when B is not a multiple of P
    # (< P extra rows); the deterministic test uses B % P == 0 so no pad occurs.
    rows = pl.cdiv(B, P)
    B_pack = rows * P
    x = node_feats
    if B_pack != B:
        x = jnp.pad(x, ((0, B_pack - B), (0, 0)))
    xp = x.reshape(rows, PK)  # free row-major view

    # --- Tile size: as large as a ~24 MiB working-set budget allows (v5e/v6e/v7x safe)
    itemsize = jnp.dtype(x.dtype).itemsize
    fixed = 2 * (w_blk.size * jnp.dtype(w_blk.dtype).itemsize
                 + b_blk.size * jnp.dtype(b_blk.dtype).itemsize)       # double-buffered params
    per_row = 2 * (PK * itemsize + Pdd * max(itemsize, 4))             # double-buffered x + out
    budget = max((24 * 1024 * 1024) - fixed, per_row)
    tr = int(min(max_tile_rows, max(1, budget // per_row)))
    tr = min(tr, rows)
    if tr < rows:
        sub = 8 if itemsize >= 4 else (16 if itemsize == 2 else 32)    # sublane multiple
        tr = max(sub, (tr // sub) * sub)
    grid_r = pl.cdiv(rows, tr)   # ragged last block is masked by Pallas; no batch pad/slice

    out2d = pl.pallas_call(
        _sqvec2symmat_kernel,
        out_shape=jax.ShapeDtypeStruct((rows, Pdd), node_feats.dtype),
        grid_spec=pltpu.PrefetchScalarGridSpec(
            num_scalar_prefetch=0,
            grid=(grid_r,),
            in_specs=[
                pl.BlockSpec((tr, PK), lambda i: (i, 0)),
                pl.BlockSpec((PK, Pdd), lambda i: (0, 0)),   # resident weight
                pl.BlockSpec((1, Pdd), lambda i: (0, 0)),    # resident bias
            ],
            out_specs=pl.BlockSpec((tr, Pdd), lambda i: (i, 0)),
        ),
        compiler_params=pltpu.CompilerParams(
            dimension_semantics=("parallel",),
            vmem_limit_bytes=vmem_limit_bytes,
        ),
    )(xp, w_blk, b_blk)

    # Free row-major views: (rows, P*dd) -> (B_pack, dd) -> (B, d, d).
    out = out2d.reshape(B_pack, dd)
    if B_pack != B:
        out = out[:B]
    return out.reshape(B, d, d)


def reference(node_feats, weight, bias, output_dims):
    y = node_feats @ weight.T + bias
    a = y.reshape(-1, output_dims, output_dims)
    return 0.5 * (a + jnp.swapaxes(a, -1, -2))


if __name__ == "__main__":
    key = jax.random.PRNGKey(0)
    k_x, k_w, k_b, k_x2 = jax.random.split(key, 4)

    B = 64
    input_dims = 32
    output_dims = 4           # Linear out_features = output_dims**2 = 16

    # Deterministic "parameters" (synthetic init, matching nn.Linear shapes)
    weight = jax.random.normal(k_w, (output_dims * output_dims, input_dims),
                               dtype=jnp.float32) * 0.1
    bias = jax.random.normal(k_b, (output_dims * output_dims,),
                             dtype=jnp.float32) * 0.1
    x = jax.random.normal(k_x, (B, input_dims), dtype=jnp.float32)

    # One-time parameter fold (off the forward hot path).
    w_blk, b_blk, pack = fold_params(weight, bias, input_dims, output_dims)

    out = squared_vec2symmat(x, w_blk, b_blk, output_dims, pack)
    out = jax.block_until_ready(out)

    ref = reference(x, weight, bias, output_dims)
    assert out.shape == (B, output_dims, output_dims)
    assert jnp.allclose(out, ref, atol=1e-5, rtol=1e-5)
    # symmetry check
    assert jnp.allclose(out, jnp.swapaxes(out, -1, -2), atol=1e-6)

    # Ragged-batch path (B not a multiple of the pack factor) sanity check.
    B2 = 70
    x2 = jax.random.normal(k_x2, (B2, input_dims), dtype=jnp.float32)
    out2 = jax.block_until_ready(
        squared_vec2symmat(x2, w_blk, b_blk, output_dims, pack))
    assert jnp.allclose(out2, reference(x2, weight, bias, output_dims),
                        atol=1e-5, rtol=1e-5)

    print("KERNEL_OK")
</pallas_src>

<mosaic_0001>
module attributes {stable_mosaic.version = 11 : i64} {
  func.func @_sqvec2symmat_kernel(%arg0: i32, %arg1: memref<8x256xf32, #tpu.memory_space<vmem>>, %arg2: memref<256x128xf32, #tpu.memory_space<vmem>>, %arg3: memref<1x128xf32, #tpu.memory_space<vmem>>, %arg4: memref<8x128xf32, #tpu.memory_space<vmem>>) attributes {dimension_semantics = [#tpu.dimension_semantics<parallel>], iteration_bounds = array<i64: 1>, scalar_prefetch = 0 : i64, scratch_operands = 0 : i64, tpu.core_type = #tpu.core_type<tc>, window_params = [{transform_indices = @transform_0, window_bounds = array<i64: 8, 256>}, {pipeline_mode = #tpu.pipeline_mode<synchronous>, transform_indices = @transform_1, window_bounds = array<i64: 256, 128>}, {pipeline_mode = #tpu.pipeline_mode<synchronous>, transform_indices = @transform_2, window_bounds = array<i64: 1, 128>}, {transform_indices = @transform_3, window_bounds = array<i64: 8, 128>}]} {
    %c0 = arith.constant 0 : index
    %c0_0 = arith.constant 0 : index
    %0 = vector.load %arg1[%c0, %c0_0] : memref<8x256xf32, #tpu.memory_space<vmem>>, vector<8x256xf32>
    %c0_1 = arith.constant 0 : index
    %c0_2 = arith.constant 0 : index
    %1 = vector.load %arg2[%c0_1, %c0_2] : memref<256x128xf32, #tpu.memory_space<vmem>>, vector<256x128xf32>
    %cst = arith.constant dense<0.000000e+00> : vector<8x128xf32>
    %2 = tpu.matmul %0, %1, %cst {dimension_numbers = #tpu.dot_dimension_numbers<[1], [0], [0], [1], [0, 0, 1, 1], [], []>} : vector<8x256xf32>, vector<256x128xf32>, vector<8x128xf32> -> vector<8x128xf32>
    %c0_3 = arith.constant 0 : index
    %c0_4 = arith.constant 0 : index
    %3 = vector.load %arg3[%c0_3, %c0_4] : memref<1x128xf32, #tpu.memory_space<vmem>>, vector<1x128xf32>
    %4 = vector.broadcast %3 : vector<1x128xf32> to vector<8x128xf32>
    %5 = arith.addf %2, %4 : vector<8x128xf32>
    %c0_5 = arith.constant 0 : index
    %c0_6 = arith.constant 0 : index
    %6 = vector.load %arg4[%c0_5, %c0_6] : memref<8x128xf32, #tpu.memory_space<vmem>>, vector<8x128xf32>
    tpu.vector_store %arg4[%c0_5, %c0_6], %5 {strides = array<i32>} : memref<8x128xf32, #tpu.memory_space<vmem>>, vector<8x128xf32>,
    return
  }
  func.func @transform_0(%arg0: i32) -> (i32, i32) {
    %c0_i32 = arith.constant 0 : i32
    %c0_i32_0 = arith.constant 0 : i32
    return %arg0, %c0_i32 : i32, i32
  }
  func.func @transform_1(%arg0: i32) -> (i32, i32) {
    %c0_i32 = arith.constant 0 : i32
    %c0_i32_0 = arith.constant 0 : i32
    %c0_i32_1 = arith.constant 0 : i32
    return %c0_i32, %c0_i32_0 : i32, i32
  }
  func.func @transform_2(%arg0: i32) -> (i32, i32) {
    %c0_i32 = arith.constant 0 : i32
    %c0_i32_0 = arith.constant 0 : i32
    %c0_i32_1 = arith.constant 0 : i32
    return %c0_i32, %c0_i32_0 : i32, i32
  }
  func.func @transform_3(%arg0: i32) -> (i32, i32) {
    %c0_i32 = arith.constant 0 : i32
    %c0_i32_0 = arith.constant 0 : i32
    return %arg0, %c0_i32 : i32, i32
  }
}

</mosaic_0001>

<bundles_post_ra>
// kernel: tpu_custom_call.1
= control target key start
LH: loop header
LB: loop body
LE: loop exit
PB: predicated region body
PF: predicated region fallthrough
CT: control target
= control target key end

     0   :  { %8 = vsyncpa [#allocation3], 0  ;;  %s263_s0 = inlined_call_operand.hbm [shape: f32[8,256], index: 0, kind: input, shape index: {}]   ;;  %s264_s1 = inlined_call_operand.hbm [shape: f32[256,128], index: 1, kind: input, shape index: {}]   ;;  %s265_s2 = inlined_call_operand.vmem [shape: f32[1,128], index: 2, kind: input, shape index: {}]   ;;  %s266_s3 = inlined_call_operand.hbm [shape: f32[8,128], index: 3, kind: output, shape index: {}]  }
   0x1   :  { %9 = vsyncpa [#allocation6], 0 }
   0x2   :  { %10 = vsyncpa [#allocation4], 0  ;;  %s16_s14 = sshll.u32 %s263_s0, 4  ;;  %s226_s15 = smov [#allocation2]   ;;  %s17_s14 = int_to_ptr.hbm [resolvable:$true] %s16_s14 }
   0x3   :  { %s18_s16 = sshll.u32 %s226_s15, 4  ;;  %s26_s19 = sshll.u32 %s264_s1, 4  ;;  %s19_s16 = int_to_ptr.vmem [resolvable:$true] %s18_s16  ;;  %s27_s19 = int_to_ptr.hbm [resolvable:$true] %s26_s19 }
   0x4   :  { %21 = dma.hbm_to_vmem [thread:$0]  %s17_s14, 256, %s19_s16, [#allocation3]  }
   0x5   :  { %s227_s20 = smov [#allocation5]   ;;  %s228_s22 = smov 128  }
   0x6   :  { %s28_s21 = sshll.u32 %s227_s20, 4  ;;  %s229_s23 = smov 8   ;;  %s29_s21 = int_to_ptr.vmem [resolvable:$true] %s28_s21 }
   0x7   :  { %34 = dma.hbm_to_vmem [thread:$0]  %s27_s19, 4096, %s29_s21, [#allocation6], %s228_s22, %s228_s22, %s229_s23  }
   0x8   :  { %220 = dma.done.wait [#allocation3], 256  }
   0x9   :  { %221 = vsyncadd [#allocation3], 4294967040 }
   0xa   :  { %222 = dma.done.wait [#allocation6], 4096  }
   0xb   :  { %223 = vsyncadd [#allocation6], 4294963200  ;;  %v62_v0 = vld [vmem:[#allocation5 + $0x78] sm:$0xff]  ;;  %v61_v1 = vld [vmem:[#allocation5 + $0x70] sm:$0xff]  ;;  %s230_s24 = smov [#allocation7]   ;;  %s131_s28 = sshll.u32 %s266_s3, 4  ;;  %s132_s28 = int_to_ptr.hbm [resolvable:$true] %s131_s28 }
   0xc   :  { %v78_v2 = vld [vmem:[#allocation5 + $0xf8] sm:$0xff]  ;;  %83 = vmatpush.msra.mxu0 %v62_v0  ;;  %v77_v3 = vld [vmem:[#allocation5 + $0xf0] sm:$0xff]  ;;  %v60_v4 = vld [vmem:[#allocation5 + $0x68] sm:$0xff]  ;;  %s129_s25 = sshll.u32 %s230_s24, 4  ;;  %s130_s25 = int_to_ptr.vmem [resolvable:$true] %s129_s25 }
   0xd   :  { %103 = vmatpush.msra.mxu1 %v78_v2  ;;  %v76_v5 = vld [vmem:[#allocation5 + $0xe8] sm:$0xff]  ;;  %v59_v6 = vld [vmem:[#allocation5 + $0x60] sm:$0xff]  ;;  %v58_v8 = vld [vmem:[#allocation5 + $0x58] sm:$0xff] }
   0xe   :  { %84 = vmatpush.msra.mxu0 %v61_v1  ;;  %v75_v7 = vld [vmem:[#allocation5 + $0xe0] sm:$0xff]  ;;  %v74_v9 = vld [vmem:[#allocation5 + $0xd8] sm:$0xff]  ;;  %v57_v10 = vld [vmem:[#allocation5 + $0x50] sm:$0xff] }
   0xf   :  { %104 = vmatpush.msra.mxu1 %v77_v3  ;;  %v73_v11 = vld [vmem:[#allocation5 + $0xd0] sm:$0xff]  ;;  %v56_v12 = vld [vmem:[#allocation5 + $0x48] sm:$0xff]  ;;  %v55_v14 = vld [vmem:[#allocation5 + $0x40] sm:$0xff] }
  0x10   :  { %85 = vmatpush.msra.mxu0 %v60_v4  ;;  %v72_v13 = vld [vmem:[#allocation5 + $0xc8] sm:$0xff]  ;;  %v71_v15 = vld [vmem:[#allocation5 + $0xc0] sm:$0xff]  ;;  %v54_v16 = vld [vmem:[#allocation5 + $0x38] sm:$0xff] }
  0x11   :  { %105 = vmatpush.msra.mxu1 %v76_v5  ;;  %v70_v17 = vld [vmem:[#allocation5 + $0xb8] sm:$0xff]  ;;  %v53_v18 = vld [vmem:[#allocation5 + $0x30] sm:$0xff]  ;;  %v52_v20 = vld [vmem:[#allocation5 + $0x28] sm:$0xff] }
  0x12   :  { %86 = vmatpush.msra.mxu0 %v59_v6  ;;  %v69_v19 = vld [vmem:[#allocation5 + $0xb0] sm:$0xff]  ;;  %v68_v21 = vld [vmem:[#allocation5 + $0xa8] sm:$0xff]  ;;  %v51_v22 = vld [vmem:[#allocation5 + $0x20] sm:$0xff] }
  0x13   :  { %106 = vmatpush.msra.mxu1 %v75_v7  ;;  %v67_v23 = vld [vmem:[#allocation5 + $0xa0] sm:$0xff]  ;;  %v50_v24 = vld [vmem:[#allocation5 + $0x18] sm:$0xff]  ;;  %v49_v26 = vld [vmem:[#allocation5 + $0x10] sm:$0xff] }
  0x14   :  { %87 = vmatpush.msra.mxu0 %v58_v8  ;;  %v66_v25 = vld [vmem:[#allocation5 + $0x98] sm:$0xff]  ;;  %v65_v27 = vld [vmem:[#allocation5 + $0x90] sm:$0xff]  ;;  %v48_v28 = vld [vmem:[#allocation5 + $0x8] sm:$0xff] }
  0x15   :  { %107 = vmatpush.msra.mxu1 %v74_v9  ;;  %v64_v29 = vld [vmem:[#allocation5 + $0x88] sm:$0xff]  ;;  %v47_v30 = vld [vmem:[#allocation5] sm:$0xff]  ;;  %v45_v32 = vld [vmem:[#allocation2] sm:$0xff] }
  0x16   :  { %88 = vmatpush.msra.mxu0 %v57_v10  ;;  %v63_v31 = vld [vmem:[#allocation5 + $0x80] sm:$0xff]  ;;  %v46_v33 = vld [vmem:[#allocation2 + $0x8] sm:$0xff]  ;;  %v147_v34 = vld [vmem:[%s265_s2] ss:$0 sm:$0xff] }
  0x17   :  { %108 = vmatpush.msra.mxu1 %v73_v11 }
  0x18   :  { %89 = vmatpush.msra.mxu0 %v56_v12 }
  0x19   :  { %109 = vmatpush.msra.mxu1 %v72_v13 }
  0x1a   :  { %90 = vmatpush.msra.mxu0 %v55_v14 }
  0x1b   :  { %110 = vmatpush.msra.mxu1 %v71_v15 }
  0x1c   :  { %91 = vmatpush.msra.mxu0 %v54_v16 }
  0x1d   :  { %111 = vmatpush.msra.mxu1 %v70_v17 }
  0x1e   :  { %92 = vmatpush.msra.mxu0 %v53_v18 }
  0x1f   :  { %112 = vmatpush.msra.mxu1 %v69_v19 }
  0x20   :  { %93 = vmatpush.msra.mxu0 %v52_v20 }
  0x21   :  { %113 = vmatpush.msra.mxu1 %v68_v21 }
  0x22   :  { %94 = vmatpush.msra.mxu0 %v51_v22 }
  0x23   :  { %114 = vmatpush.msra.mxu1 %v67_v23 }
  0x24   :  { %95 = vmatpush.msra.mxu0 %v50_v24 }
  0x25   :  { %115 = vmatpush.msra.mxu1 %v66_v25 }
  0x26   :  { %96 = vmatpush.msra.mxu0 %v49_v26 }
  0x27   :  { %116 = vmatpush.msra.mxu1 %v65_v27 }
  0x28   :  { %97 = vmatpush.msra.mxu0 %v48_v28 }
  0x29   :  { %117 = vmatpush.msra.mxu1 %v64_v29 }
  0x2a   :  { %98 = vmatpush.msra.mxu0 %v47_v30 }
  0x2b   :  { %118 = vmatpush.msra.mxu1 %v63_v31  ;;  %99 = vmatmul.f32.vlgmr.msra.gmra.mxu0 %v45_v32 }
  0x2c   :  { %119 = vmatmul.f32.vlgmr.msra.gmra.mxu1 %v46_v33 }
  0xa8   :  { %v100_v35 = vpop.f32.mrf.mxu0 }
  0xa9   :  { %v120_v36 = vpop.f32.mrf.mxu1  ;;  %v101_v37 = vadd.f32 %v147_v34, %v100_v35 }
  0xab   :  { %v121_v38 = vadd.f32 %v120_v36, %v101_v37 }
  0xad   :  { %123 = vst [vmem:[#allocation7] sm:$0xff] %v121_v38 }
  0xae   :  { %134 = dma.vmem_to_hbm [thread:$0]  %s130_s25, 128, %s132_s28, [#allocation4]  }
  0xaf   :  { %224 = dma.done.wait [#allocation4], 128  }
  0xb0   :  { %225 = vsyncadd [#allocation4], 4294967168 }
  0xb1   :  { %139 = vsyncpa [#allocation3], 1 }
  0xb2   :  { %140 = vsyncpa [#allocation6], 1 }
  0xb3   :  { %141 = vsyncpa [#allocation4], 1 }

</bundles_post_ra>
